<compile_context>
chip_gen: v7x
topology: tpu7x:2x2x1
jax: 0.10.0
libtpu: 0.0.40
codegen_flags: <defaults>
</compile_context>

<pallas_src>
import numpy as np
import jax
import jax.numpy as jnp
from jax.experimental import pallas as pl
from jax.experimental.pallas import tpu as pltpu


# ----------------------------------------------------------------------------
# Fused kernel: [Conv1d(k=3,'same',no bias) + BN + ReLU] x n_blocks + Linear
# ----------------------------------------------------------------------------
def make_cnn_kernel(n_batch, length, channels, eps):
    n_blocks = len(channels) - 1
    inv_cnt = 1.0 / float(n_batch * length)

    def kernel(*refs):
        # --- unpack: x, shift mats, (w,g,b) per block, flatten mats, fc, out --
        x_ref, sp_ref, sn_ref = refs[0], refs[1], refs[2]
        conv_refs = [refs[3 + 3 * b: 6 + 3 * b] for b in range(n_blocks)]
        (rep_ref, mask_ref, ind_ref,
         fcw_ref, fcb_ref) = refs[3 + 3 * n_blocks: 8 + 3 * n_blocks]
        o_ref = refs[8 + 3 * n_blocks]

        # Activation stays vreg/VMEM-resident for the whole forward, stacked as
        # (N*L, C) so every matmul has the batch folded into its M dimension.
        h = x_ref[...]
        s_prev = sp_ref[...]        # (R, R): row r <- row r-1, 0 at l==0
        s_next = sn_ref[...]        # (R, R): row r <- row r+1, 0 at l==L-1

        for blk in range(n_blocks):
            w_ref, g_ref, b_ref = conv_refs[blk]     # (3,Cin,Cout),(1,Cout),(1,Cout)

            # 'same' zero padding + tap shift as constant matmuls (boundary
            # zeros are baked into s_prev / s_next): no scratch, no masked
            # stores, no relayouts -- just extra tiny MXU pushes.
            tap_p = jnp.dot(s_prev, h, preferred_element_type=jnp.float32)
            tap_n = jnp.dot(s_next, h, preferred_element_type=jnp.float32)

            # Conv as 3 batch-folded matmuls: (N*L, Cin) @ (Cin, Cout).
            y = (jnp.dot(tap_p, w_ref[0], preferred_element_type=jnp.float32)
                 + jnp.dot(h,    w_ref[1], preferred_element_type=jnp.float32)
                 + jnp.dot(tap_n, w_ref[2], preferred_element_type=jnp.float32))

            # BatchNorm1d (training-mode batch stats), centered two-pass
            # variance for numerical safety, then affine + ReLU. All f32.
            mean = jnp.sum(y, axis=0, keepdims=True) * inv_cnt       # (1, Cout)
            d = y - mean
            var = jnp.sum(d * d, axis=0, keepdims=True) * inv_cnt
            inv = jax.lax.rsqrt(var + eps)
            h = jnp.maximum(d * (inv * g_ref[...]) + b_ref[...], 0.0)

        # Flatten in (l, c) order via constant matmuls (no reshapes / per-row
        # stores):  hrep[r, l*C+c] = h[r, c]   (replicate along lanes, MXU)
        #           hexp = hrep * mask         (keep only the l == l(r) slab)
        #           flat = ind @ hexp          (sum each batch's rows -> (N, L*C))
        # The FC weight was pre-permuted in the wrapper so (l, c) order matches
        # PyTorch's (c, l) flatten of the NCL tensor; FC output is lane-dense
        # (padded to 128 lanes, sliced back in the wrapper).
        hrep = jnp.dot(h, rep_ref[...], preferred_element_type=jnp.float32)
        flat = jnp.dot(ind_ref[...], hrep * mask_ref[...],
                       preferred_element_type=jnp.float32)
        o_ref[...] = (jnp.dot(flat, fcw_ref[...],
                              preferred_element_type=jnp.float32) + fcb_ref[...])

    return kernel


# ----------------------------------------------------------------------------
# Wrapper: single pallas_call for the whole forward
# ----------------------------------------------------------------------------
def cnn_forward(x_ncl, params, eps=1e-5):
    n, c0, length = x_ncl.shape
    channels = [c0] + [w.shape[0] for (w, _, _) in params["convs"]]
    n_blocks = len(channels) - 1
    c_last = channels[-1]
    out_f = params["fc_w"].shape[0]
    out_pad = ((out_f + 127) // 128) * 128          # lane-dense FC output width
    rows = n * length
    feat = length * c_last

    # NCL -> channels-last with batch folded into matmul-M rows: (N*L, C0).
    x2d = jnp.transpose(x_ncl, (0, 2, 1)).reshape(rows, c0).astype(jnp.float32)

    # Constant shift matrices for the k=3 'same' conv taps; the batch-boundary
    # zero rows implement the zero padding.
    r = np.arange(rows)
    s_prev = np.zeros((rows, rows), np.float32)
    keep = (r % length) != 0
    s_prev[r[keep], r[keep] - 1] = 1.0
    s_next = np.zeros((rows, rows), np.float32)
    keep = (r % length) != (length - 1)
    s_next[r[keep], r[keep] + 1] = 1.0

    # Constant matrices for the matmul-based flatten.
    j = np.arange(feat)
    rep = np.zeros((c_last, feat), np.float32)       # replicate h along lanes
    rep[j % c_last, j] = 1.0
    mask = ((j[None, :] // c_last) == (r % length)[:, None]).astype(np.float32)
    ind = (np.arange(n)[:, None] == (r // length)[None, :]).astype(np.float32)

    inputs = [x2d, jnp.asarray(s_prev), jnp.asarray(s_next)]
    in_specs = [pl.BlockSpec((rows, c0), lambda i: (0, 0)),
                pl.BlockSpec((rows, rows), lambda i: (0, 0)),
                pl.BlockSpec((rows, rows), lambda i: (0, 0))]

    for blk, (w, g, b) in enumerate(params["convs"]):
        cin, cout = channels[blk], channels[blk + 1]
        wk = jnp.transpose(w, (2, 1, 0)).astype(jnp.float32)     # (3, Cin, Cout)
        inputs += [wk,
                   g.reshape(1, cout).astype(jnp.float32),
                   b.reshape(1, cout).astype(jnp.float32)]
        in_specs += [pl.BlockSpec((3, cin, cout), lambda i: (0, 0, 0)),
                     pl.BlockSpec((1, cout), lambda i: (0, 0)),
                     pl.BlockSpec((1, cout), lambda i: (0, 0))]

    # FC weight: PyTorch flatten over (N, C, L) uses feature index c*L + l; the
    # kernel flattens in (l, c) order, so permute the weight once here (cheap,
    # weights only), transpose, and zero-pad the output dim to 128 lanes.
    w_lc = jnp.transpose(params["fc_w"].reshape(out_f, c_last, length),
                         (0, 2, 1)).reshape(out_f, feat)
    fcw = jnp.pad(jnp.transpose(w_lc),
                  ((0, 0), (0, out_pad - out_f))).astype(jnp.float32)
    fcb = jnp.pad(params["fc_b"], (0, out_pad - out_f)).reshape(1, out_pad).astype(jnp.float32)

    inputs += [jnp.asarray(rep), jnp.asarray(mask), jnp.asarray(ind), fcw, fcb]
    in_specs += [pl.BlockSpec((c_last, feat), lambda i: (0, 0)),
                 pl.BlockSpec((rows, feat), lambda i: (0, 0)),
                 pl.BlockSpec((n, rows), lambda i: (0, 0)),
                 pl.BlockSpec((feat, out_pad), lambda i: (0, 0)),
                 pl.BlockSpec((1, out_pad), lambda i: (0, 0))]

    kernel = make_cnn_kernel(n, length, channels, eps)
    out = pl.pallas_call(
        kernel,
        out_shape=jax.ShapeDtypeStruct((n, out_pad), jnp.float32),
        grid=(1,),
        in_specs=in_specs,
        out_specs=pl.BlockSpec((n, out_pad), lambda i: (0, 0)),
        compiler_params=pltpu.CompilerParams(
            dimension_semantics=("arbitrary",),
            vmem_limit_bytes=32 * 1024 * 1024),   # v7x-safe; working set << 1 MiB
    )(*inputs)
    return out[:, :out_f]


# ----------------------------------------------------------------------------
# Parameter init (mirrors the PyTorch module's shapes)
# ----------------------------------------------------------------------------
def init_params(key, channels, out_features=82, seq_len=23):
    params = {"convs": []}
    for i in range(1, len(channels)):
        key, k1, k2, k3 = jax.random.split(key, 4)
        cin, cout = channels[i - 1], channels[i]
        w = 0.2 * jax.random.normal(k1, (cout, cin, 3), jnp.float32)
        gamma = 1.0 + 0.1 * jax.random.normal(k2, (cout,), jnp.float32)
        beta = 0.1 * jax.random.normal(k3, (cout,), jnp.float32)
        params["convs"].append((w, gamma, beta))
    key, k1, k2 = jax.random.split(key, 3)
    fin = seq_len * channels[-1]
    params["fc_w"] = 0.05 * jax.random.normal(k1, (out_features, fin), jnp.float32)
    params["fc_b"] = 0.05 * jax.random.normal(k2, (out_features,), jnp.float32)
    return params


# ----------------------------------------------------------------------------
# Pure-JAX reference (for correctness check only)
# ----------------------------------------------------------------------------
def cnn_reference(x_ncl, params, eps=1e-5):
    h = x_ncl
    for (w, g, b) in params["convs"]:
        y = jax.lax.conv_general_dilated(
            h, w, window_strides=(1,), padding="SAME",
            dimension_numbers=("NCH", "OIH", "NCH"),
            precision=jax.lax.Precision.HIGHEST)
        mean = jnp.mean(y, axis=(0, 2), keepdims=True)
        var = jnp.mean((y - mean) ** 2, axis=(0, 2), keepdims=True)
        y = (y - mean) * jax.lax.rsqrt(var + eps)
        y = y * g.reshape(1, -1, 1) + b.reshape(1, -1, 1)
        h = jnp.maximum(y, 0.0)
    flat = h.reshape(h.shape[0], -1)
    return jnp.dot(flat, params["fc_w"].T,
                   precision=jax.lax.Precision.HIGHEST) + params["fc_b"]


if __name__ == "__main__":
    channels = [4, 8, 16]
    seq_len = 23          # fixed by nn.Linear(23 * channels[-1], 82)
    batch = 2

    key = jax.random.PRNGKey(0)
    key, kx = jax.random.split(key)
    x = jax.random.normal(kx, (batch, channels[0], seq_len), jnp.float32)  # NCL
    params = init_params(key, channels, seq_len=seq_len)

    fwd = jax.jit(cnn_forward)
    out = jax.block_until_ready(fwd(x, params))
    ref = jax.block_until_ready(cnn_reference(x, params))

    assert out.shape == (batch, 82), out.shape
    if not jnp.allclose(out, ref, rtol=1e-2, atol=1e-2):
        raise AssertionError(
            f"mismatch, max abs diff = {float(jnp.max(jnp.abs(out - ref)))}")
    print("KERNEL_OK")
</pallas_src>

<mosaic_0001>
module attributes {stable_mosaic.version = 11 : i64} {
  func.func @kernel(%arg0: i32, %arg1: memref<46x4xf32, #tpu.memory_space<vmem>>, %arg2: memref<46x46xf32, #tpu.memory_space<vmem>>, %arg3: memref<46x46xf32, #tpu.memory_space<vmem>>, %arg4: memref<3x4x8xf32, #tpu.memory_space<vmem>>, %arg5: memref<1x8xf32, #tpu.memory_space<vmem>>, %arg6: memref<1x8xf32, #tpu.memory_space<vmem>>, %arg7: memref<3x8x16xf32, #tpu.memory_space<vmem>>, %arg8: memref<1x16xf32, #tpu.memory_space<vmem>>, %arg9: memref<1x16xf32, #tpu.memory_space<vmem>>, %arg10: memref<16x368xf32, #tpu.memory_space<vmem>>, %arg11: memref<46x368xf32, #tpu.memory_space<vmem>>, %arg12: memref<2x46xf32, #tpu.memory_space<vmem>>, %arg13: memref<368x128xf32, #tpu.memory_space<vmem>>, %arg14: memref<1x128xf32, #tpu.memory_space<vmem>>, %arg15: memref<2x128xf32, #tpu.memory_space<vmem>>) attributes {dimension_semantics = [#tpu.dimension_semantics<arbitrary>], iteration_bounds = array<i64: 1>, scalar_prefetch = 0 : i64, scratch_operands = 0 : i64, tpu.core_type = #tpu.core_type<tc>, window_params = [{pipeline_mode = #tpu.pipeline_mode<synchronous>, transform_indices = @transform_0, window_bounds = array<i64: 46, 4>}, {pipeline_mode = #tpu.pipeline_mode<synchronous>, transform_indices = @transform_1, window_bounds = array<i64: 46, 46>}, {pipeline_mode = #tpu.pipeline_mode<synchronous>, transform_indices = @transform_2, window_bounds = array<i64: 46, 46>}, {pipeline_mode = #tpu.pipeline_mode<synchronous>, transform_indices = @transform_3, window_bounds = array<i64: 3, 4, 8>}, {pipeline_mode = #tpu.pipeline_mode<synchronous>, transform_indices = @transform_4, window_bounds = array<i64: 1, 8>}, {pipeline_mode = #tpu.pipeline_mode<synchronous>, transform_indices = @transform_5, window_bounds = array<i64: 1, 8>}, {pipeline_mode = #tpu.pipeline_mode<synchronous>, transform_indices = @transform_6, window_bounds = array<i64: 3, 8, 16>}, {pipeline_mode = #tpu.pipeline_mode<synchronous>, transform_indices = @transform_7, window_bounds = array<i64: 1, 16>}, {pipeline_mode = #tpu.pipeline_mode<synchronous>, transform_indices = @transform_8, window_bounds = array<i64: 1, 16>}, {pipeline_mode = #tpu.pipeline_mode<synchronous>, transform_indices = @transform_9, window_bounds = array<i64: 16, 368>}, {pipeline_mode = #tpu.pipeline_mode<synchronous>, transform_indices = @transform_10, window_bounds = array<i64: 46, 368>}, {pipeline_mode = #tpu.pipeline_mode<synchronous>, transform_indices = @transform_11, window_bounds = array<i64: 2, 46>}, {pipeline_mode = #tpu.pipeline_mode<synchronous>, transform_indices = @transform_12, window_bounds = array<i64: 368, 128>}, {pipeline_mode = #tpu.pipeline_mode<synchronous>, transform_indices = @transform_13, window_bounds = array<i64: 1, 128>}, {pipeline_mode = #tpu.pipeline_mode<synchronous>, transform_indices = @transform_14, window_bounds = array<i64: 2, 128>}]} {
    %c0 = arith.constant 0 : index
    %c0_0 = arith.constant 0 : index
    %0 = vector.load %arg1[%c0, %c0_0] : memref<46x4xf32, #tpu.memory_space<vmem>>, vector<46x4xf32>
    %c0_1 = arith.constant 0 : index
    %c0_2 = arith.constant 0 : index
    %1 = vector.load %arg2[%c0_1, %c0_2] : memref<46x46xf32, #tpu.memory_space<vmem>>, vector<46x46xf32>
    %c0_3 = arith.constant 0 : index
    %c0_4 = arith.constant 0 : index
    %2 = vector.load %arg3[%c0_3, %c0_4] : memref<46x46xf32, #tpu.memory_space<vmem>>, vector<46x46xf32>
    %cst = arith.constant dense<0.000000e+00> : vector<46x4xf32>
    %3 = tpu.matmul %1, %0, %cst {dimension_numbers = #tpu.dot_dimension_numbers<[1], [0], [0], [1], [0, 0, 1, 1], [], []>} : vector<46x46xf32>, vector<46x4xf32>, vector<46x4xf32> -> vector<46x4xf32>
    %cst_5 = arith.constant dense<0.000000e+00> : vector<46x4xf32>
    %4 = tpu.matmul %2, %0, %cst_5 {dimension_numbers = #tpu.dot_dimension_numbers<[1], [0], [0], [1], [0, 0, 1, 1], [], []>} : vector<46x46xf32>, vector<46x4xf32>, vector<46x4xf32> -> vector<46x4xf32>
    %c0_6 = arith.constant 0 : index
    %c0_7 = arith.constant 0 : index
    %c0_8 = arith.constant 0 : index
    %5 = vector.load %arg4[%c0_6, %c0_7, %c0_8] : memref<3x4x8xf32, #tpu.memory_space<vmem>>, vector<1x4x8xf32>
    %6 = vector.shape_cast %5 : vector<1x4x8xf32> to vector<4x8xf32>
    %cst_9 = arith.constant dense<0.000000e+00> : vector<46x8xf32>
    %7 = tpu.matmul %3, %6, %cst_9 {dimension_numbers = #tpu.dot_dimension_numbers<[1], [0], [0], [1], [0, 0, 1, 1], [], []>} : vector<46x4xf32>, vector<4x8xf32>, vector<46x8xf32> -> vector<46x8xf32>
    %c1 = arith.constant 1 : index
    %c0_10 = arith.constant 0 : index
    %c0_11 = arith.constant 0 : index
    %8 = vector.load %arg4[%c1, %c0_10, %c0_11] : memref<3x4x8xf32, #tpu.memory_space<vmem>>, vector<1x4x8xf32>
    %9 = vector.shape_cast %8 : vector<1x4x8xf32> to vector<4x8xf32>
    %cst_12 = arith.constant dense<0.000000e+00> : vector<46x8xf32>
    %10 = tpu.matmul %0, %9, %cst_12 {dimension_numbers = #tpu.dot_dimension_numbers<[1], [0], [0], [1], [0, 0, 1, 1], [], []>} : vector<46x4xf32>, vector<4x8xf32>, vector<46x8xf32> -> vector<46x8xf32>
    %11 = arith.addf %7, %10 : vector<46x8xf32>
    %c2 = arith.constant 2 : index
    %c0_13 = arith.constant 0 : index
    %c0_14 = arith.constant 0 : index
    %12 = vector.load %arg4[%c2, %c0_13, %c0_14] : memref<3x4x8xf32, #tpu.memory_space<vmem>>, vector<1x4x8xf32>
    %13 = vector.shape_cast %12 : vector<1x4x8xf32> to vector<4x8xf32>
    %cst_15 = arith.constant dense<0.000000e+00> : vector<46x8xf32>
    %14 = tpu.matmul %4, %13, %cst_15 {dimension_numbers = #tpu.dot_dimension_numbers<[1], [0], [0], [1], [0, 0, 1, 1], [], []>} : vector<46x4xf32>, vector<4x8xf32>, vector<46x8xf32> -> vector<46x8xf32>
    %15 = arith.addf %11, %14 : vector<46x8xf32>
    %cst_16 = arith.constant dense<0.000000e+00> : vector<8xf32>
    %16 = vector.multi_reduction <add>, %15, %cst_16 [0] : vector<46x8xf32> to vector<8xf32>
    %17 = vector.shape_cast %16 : vector<8xf32> to vector<1x8xf32>
    %cst_17 = arith.constant 0.0217391308 : f32
    %18 = vector.broadcast %cst_17 : f32 to vector<1x8xf32>
    %19 = arith.mulf %17, %18 : vector<1x8xf32>
    %20 = vector.broadcast %19 : vector<1x8xf32> to vector<46x8xf32>
    %21 = arith.subf %15, %20 : vector<46x8xf32>
    %22 = arith.mulf %21, %21 : vector<46x8xf32>
    %cst_18 = arith.constant dense<0.000000e+00> : vector<8xf32>
    %23 = vector.multi_reduction <add>, %22, %cst_18 [0] : vector<46x8xf32> to vector<8xf32>
    %24 = vector.shape_cast %23 : vector<8xf32> to vector<1x8xf32>
    %cst_19 = arith.constant 0.0217391308 : f32
    %25 = vector.broadcast %cst_19 : f32 to vector<1x8xf32>
    %26 = arith.mulf %24, %25 : vector<1x8xf32>
    %cst_20 = arith.constant 9.99999974E-6 : f32
    %27 = vector.broadcast %cst_20 : f32 to vector<1x8xf32>
    %28 = arith.addf %26, %27 : vector<1x8xf32>
    %29 = math.rsqrt %28 : vector<1x8xf32>
    %c0_21 = arith.constant 0 : index
    %c0_22 = arith.constant 0 : index
    %30 = vector.load %arg5[%c0_21, %c0_22] : memref<1x8xf32, #tpu.memory_space<vmem>>, vector<1x8xf32>
    %31 = arith.mulf %29, %30 : vector<1x8xf32>
    %32 = vector.broadcast %31 : vector<1x8xf32> to vector<46x8xf32>
    %33 = arith.mulf %21, %32 : vector<46x8xf32>
    %c0_23 = arith.constant 0 : index
    %c0_24 = arith.constant 0 : index
    %34 = vector.load %arg6[%c0_23, %c0_24] : memref<1x8xf32, #tpu.memory_space<vmem>>, vector<1x8xf32>
    %35 = vector.broadcast %34 : vector<1x8xf32> to vector<46x8xf32>
    %36 = arith.addf %33, %35 : vector<46x8xf32>
    %cst_25 = arith.constant 0.000000e+00 : f32
    %37 = vector.broadcast %cst_25 : f32 to vector<46x8xf32>
    %38 = arith.maximumf %36, %37 : vector<46x8xf32>
    %cst_26 = arith.constant dense<0.000000e+00> : vector<46x8xf32>
    %39 = tpu.matmul %1, %38, %cst_26 {dimension_numbers = #tpu.dot_dimension_numbers<[1], [0], [0], [1], [0, 0, 1, 1], [], []>} : vector<46x46xf32>, vector<46x8xf32>, vector<46x8xf32> -> vector<46x8xf32>
    %cst_27 = arith.constant dense<0.000000e+00> : vector<46x8xf32>
    %40 = tpu.matmul %2, %38, %cst_27 {dimension_numbers = #tpu.dot_dimension_numbers<[1], [0], [0], [1], [0, 0, 1, 1], [], []>} : vector<46x46xf32>, vector<46x8xf32>, vector<46x8xf32> -> vector<46x8xf32>
    %c0_28 = arith.constant 0 : index
    %c0_29 = arith.constant 0 : index
    %c0_30 = arith.constant 0 : index
    %41 = vector.load %arg7[%c0_28, %c0_29, %c0_30] : memref<3x8x16xf32, #tpu.memory_space<vmem>>, vector<1x8x16xf32>
    %42 = vector.shape_cast %41 : vector<1x8x16xf32> to vector<8x16xf32>
    %cst_31 = arith.constant dense<0.000000e+00> : vector<46x16xf32>
    %43 = tpu.matmul %39, %42, %cst_31 {dimension_numbers = #tpu.dot_dimension_numbers<[1], [0], [0], [1], [0, 0, 1, 1], [], []>} : vector<46x8xf32>, vector<8x16xf32>, vector<46x16xf32> -> vector<46x16xf32>
    %c1_32 = arith.constant 1 : index
    %c0_33 = arith.constant 0 : index
    %c0_34 = arith.constant 0 : index
    %44 = vector.load %arg7[%c1_32, %c0_33, %c0_34] : memref<3x8x16xf32, #tpu.memory_space<vmem>>, vector<1x8x16xf32>
    %45 = vector.shape_cast %44 : vector<1x8x16xf32> to vector<8x16xf32>
    %cst_35 = arith.constant dense<0.000000e+00> : vector<46x16xf32>
    %46 = tpu.matmul %38, %45, %cst_35 {dimension_numbers = #tpu.dot_dimension_numbers<[1], [0], [0], [1], [0, 0, 1, 1], [], []>} : vector<46x8xf32>, vector<8x16xf32>, vector<46x16xf32> -> vector<46x16xf32>
    %47 = arith.addf %43, %46 : vector<46x16xf32>
    %c2_36 = arith.constant 2 : index
    %c0_37 = arith.constant 0 : index
    %c0_38 = arith.constant 0 : index
    %48 = vector.load %arg7[%c2_36, %c0_37, %c0_38] : memref<3x8x16xf32, #tpu.memory_space<vmem>>, vector<1x8x16xf32>
    %49 = vector.shape_cast %48 : vector<1x8x16xf32> to vector<8x16xf32>
    %cst_39 = arith.constant dense<0.000000e+00> : vector<46x16xf32>
    %50 = tpu.matmul %40, %49, %cst_39 {dimension_numbers = #tpu.dot_dimension_numbers<[1], [0], [0], [1], [0, 0, 1, 1], [], []>} : vector<46x8xf32>, vector<8x16xf32>, vector<46x16xf32> -> vector<46x16xf32>
    %51 = arith.addf %47, %50 : vector<46x16xf32>
    %cst_40 = arith.constant dense<0.000000e+00> : vector<16xf32>
    %52 = vector.multi_reduction <add>, %51, %cst_40 [0] : vector<46x16xf32> to vector<16xf32>
    %53 = vector.shape_cast %52 : vector<16xf32> to vector<1x16xf32>
    %cst_41 = arith.constant 0.0217391308 : f32
    %54 = vector.broadcast %cst_41 : f32 to vector<1x16xf32>
    %55 = arith.mulf %53, %54 : vector<1x16xf32>
    %56 = vector.broadcast %55 : vector<1x16xf32> to vector<46x16xf32>
    %57 = arith.subf %51, %56 : vector<46x16xf32>
    %58 = arith.mulf %57, %57 : vector<46x16xf32>
    %cst_42 = arith.constant dense<0.000000e+00> : vector<16xf32>
    %59 = vector.multi_reduction <add>, %58, %cst_42 [0] : vector<46x16xf32> to vector<16xf32>
    %60 = vector.shape_cast %59 : vector<16xf32> to vector<1x16xf32>
    %cst_43 = arith.constant 0.0217391308 : f32
    %61 = vector.broadcast %cst_43 : f32 to vector<1x16xf32>
    %62 = arith.mulf %60, %61 : vector<1x16xf32>
    %cst_44 = arith.constant 9.99999974E-6 : f32
    %63 = vector.broadcast %cst_44 : f32 to vector<1x16xf32>
    %64 = arith.addf %62, %63 : vector<1x16xf32>
    %65 = math.rsqrt %64 : vector<1x16xf32>
    %c0_45 = arith.constant 0 : index
    %c0_46 = arith.constant 0 : index
    %66 = vector.load %arg8[%c0_45, %c0_46] : memref<1x16xf32, #tpu.memory_space<vmem>>, vector<1x16xf32>
    %67 = arith.mulf %65, %66 : vector<1x16xf32>
    %68 = vector.broadcast %67 : vector<1x16xf32> to vector<46x16xf32>
    %69 = arith.mulf %57, %68 : vector<46x16xf32>
    %c0_47 = arith.constant 0 : index
    %c0_48 = arith.constant 0 : index
    %70 = vector.load %arg9[%c0_47, %c0_48] : memref<1x16xf32, #tpu.memory_space<vmem>>, vector<1x16xf32>
    %71 = vector.broadcast %70 : vector<1x16xf32> to vector<46x16xf32>
    %72 = arith.addf %69, %71 : vector<46x16xf32>
    %cst_49 = arith.constant 0.000000e+00 : f32
    %73 = vector.broadcast %cst_49 : f32 to vector<46x16xf32>
    %74 = arith.maximumf %72, %73 : vector<46x16xf32>
    %c0_50 = arith.constant 0 : index
    %c0_51 = arith.constant 0 : index
    %75 = vector.load %arg10[%c0_50, %c0_51] : memref<16x368xf32, #tpu.memory_space<vmem>>, vector<16x368xf32>
    %cst_52 = arith.constant dense<0.000000e+00> : vector<46x368xf32>
    %76 = tpu.matmul %74, %75, %cst_52 {dimension_numbers = #tpu.dot_dimension_numbers<[1], [0], [0], [1], [0, 0, 1, 1], [], []>} : vector<46x16xf32>, vector<16x368xf32>, vector<46x368xf32> -> vector<46x368xf32>
    %c0_53 = arith.constant 0 : index
    %c0_54 = arith.constant 0 : index
    %77 = vector.load %arg12[%c0_53, %c0_54] : memref<2x46xf32, #tpu.memory_space<vmem>>, vector<2x46xf32>
    %c0_55 = arith.constant 0 : index
    %c0_56 = arith.constant 0 : index
    %78 = vector.load %arg11[%c0_55, %c0_56] : memref<46x368xf32, #tpu.memory_space<vmem>>, vector<46x368xf32>
    %79 = arith.mulf %76, %78 : vector<46x368xf32>
    %cst_57 = arith.constant dense<0.000000e+00> : vector<2x368xf32>
    %80 = tpu.matmul %77, %79, %cst_57 {dimension_numbers = #tpu.dot_dimension_numbers<[1], [0], [0], [1], [0, 0, 1, 1], [], []>} : vector<2x46xf32>, vector<46x368xf32>, vector<2x368xf32> -> vector<2x368xf32>
    %c0_58 = arith.constant 0 : index
    %c0_59 = arith.constant 0 : index
    %81 = vector.load %arg13[%c0_58, %c0_59] : memref<368x128xf32, #tpu.memory_space<vmem>>, vector<368x128xf32>
    %cst_60 = arith.constant dense<0.000000e+00> : vector<2x128xf32>
    %82 = tpu.matmul %80, %81, %cst_60 {dimension_numbers = #tpu.dot_dimension_numbers<[1], [0], [0], [1], [0, 0, 1, 1], [], []>} : vector<2x368xf32>, vector<368x128xf32>, vector<2x128xf32> -> vector<2x128xf32>
    %c0_61 = arith.constant 0 : index
    %c0_62 = arith.constant 0 : index
    %83 = vector.load %arg14[%c0_61, %c0_62] : memref<1x128xf32, #tpu.memory_space<vmem>>, vector<1x128xf32>
    %84 = vector.broadcast %83 : vector<1x128xf32> to vector<2x128xf32>
    %85 = arith.addf %82, %84 : vector<2x128xf32>
    %c0_63 = arith.constant 0 : index
    %c0_64 = arith.constant 0 : index
    %86 = vector.load %arg15[%c0_63, %c0_64] : memref<2x128xf32, #tpu.memory_space<vmem>>, vector<2x128xf32>
    tpu.vector_store %arg15[%c0_63, %c0_64], %85 {strides = array<i32>} : memref<2x128xf32, #tpu.memory_space<vmem>>, vector<2x128xf32>,
    return
  }
  func.func @transform_0(%arg0: i32) -> (i32, i32) {
    %c0_i32 = arith.constant 0 : i32
    %c0_i32_0 = arith.constant 0 : i32
    %c0_i32_1 = arith.constant 0 : i32
    return %c0_i32, %c0_i32_0 : i32, i32
  }
  func.func @transform_1(%arg0: i32) -> (i32, i32) {
    %c0_i32 = arith.constant 0 : i32
    %c0_i32_0 = arith.constant 0 : i32
    %c0_i32_1 = arith.constant 0 : i32
    return %c0_i32, %c0_i32_0 : i32, i32
  }
  func.func @transform_2(%arg0: i32) -> (i32, i32) {
    %c0_i32 = arith.constant 0 : i32
    %c0_i32_0 = arith.constant 0 : i32
    %c0_i32_1 = arith.constant 0 : i32
    return %c0_i32, %c0_i32_0 : i32, i32
  }
  func.func @transform_3(%arg0: i32) -> (i32, i32, i32) {
    %c0_i32 = arith.constant 0 : i32
    %c0_i32_0 = arith.constant 0 : i32
    %c0_i32_1 = arith.constant 0 : i32
    %c0_i32_2 = arith.constant 0 : i32
    return %c0_i32, %c0_i32_0, %c0_i32_1 : i32, i32, i32
  }
  func.func @transform_4(%arg0: i32) -> (i32, i32) {
    %c0_i32 = arith.constant 0 : i32
    %c0_i32_0 = arith.constant 0 : i32
    %c0_i32_1 = arith.constant 0 : i32
    return %c0_i32, %c0_i32_0 : i32, i32
  }
  func.func @transform_5(%arg0: i32) -> (i32, i32) {
    %c0_i32 = arith.constant 0 : i32
    %c0_i32_0 = arith.constant 0 : i32
    %c0_i32_1 = arith.constant 0 : i32
    return %c0_i32, %c0_i32_0 : i32, i32
  }
  func.func @transform_6(%arg0: i32) -> (i32, i32, i32) {
    %c0_i32 = arith.constant 0 : i32
    %c0_i32_0 = arith.constant 0 : i32
    %c0_i32_1 = arith.constant 0 : i32
    %c0_i32_2 = arith.constant 0 : i32
    return %c0_i32, %c0_i32_0, %c0_i32_1 : i32, i32, i32
  }
  func.func @transform_7(%arg0: i32) -> (i32, i32) {
    %c0_i32 = arith.constant 0 : i32
    %c0_i32_0 = arith.constant 0 : i32
    %c0_i32_1 = arith.constant 0 : i32
    return %c0_i32, %c0_i32_0 : i32, i32
  }
  func.func @transform_8(%arg0: i32) -> (i32, i32) {
    %c0_i32 = arith.constant 0 : i32
    %c0_i32_0 = arith.constant 0 : i32
    %c0_i32_1 = arith.constant 0 : i32
    return %c0_i32, %c0_i32_0 : i32, i32
  }
  func.func @transform_9(%arg0: i32) -> (i32, i32) {
    %c0_i32 = arith.constant 0 : i32
    %c0_i32_0 = arith.constant 0 : i32
    %c0_i32_1 = arith.constant 0 : i32
    return %c0_i32, %c0_i32_0 : i32, i32
  }
  func.func @transform_10(%arg0: i32) -> (i32, i32) {
    %c0_i32 = arith.constant 0 : i32
    %c0_i32_0 = arith.constant 0 : i32
    %c0_i32_1 = arith.constant 0 : i32
    return %c0_i32, %c0_i32_0 : i32, i32
  }
  func.func @transform_11(%arg0: i32) -> (i32, i32) {
    %c0_i32 = arith.constant 0 : i32
    %c0_i32_0 = arith.constant 0 : i32
    %c0_i32_1 = arith.constant 0 : i32
    return %c0_i32, %c0_i32_0 : i32, i32
  }
  func.func @transform_12(%arg0: i32) -> (i32, i32) {
    %c0_i32 = arith.constant 0 : i32
    %c0_i32_0 = arith.constant 0 : i32
    %c0_i32_1 = arith.constant 0 : i32
    return %c0_i32, %c0_i32_0 : i32, i32
  }
  func.func @transform_13(%arg0: i32) -> (i32, i32) {
    %c0_i32 = arith.constant 0 : i32
    %c0_i32_0 = arith.constant 0 : i32
    %c0_i32_1 = arith.constant 0 : i32
    return %c0_i32, %c0_i32_0 : i32, i32
  }
  func.func @transform_14(%arg0: i32) -> (i32, i32) {
    %c0_i32 = arith.constant 0 : i32
    %c0_i32_0 = arith.constant 0 : i32
    %c0_i32_1 = arith.constant 0 : i32
    return %c0_i32, %c0_i32_0 : i32, i32
  }
}

</mosaic_0001>

<bundles_post_ra>
// kernel: cnn_forward.1
= control target key start
LH: loop header
LB: loop body
LE: loop exit
PB: predicated region body
PF: predicated region fallthrough
CT: control target
= control target key end

     0   :  { %vm66_vm0 = vcmask 375808   ;;  %vm85_vm1 = vcmask 1045504   ;;  %vm2641_vm2 = vmmov 1   ;;  %s3239_s0 = inlined_call_operand.vmem [shape: f32[46,4], index: 0, kind: input, shape index: {}]   ;;  %s3240_s1 = inlined_call_operand.vmem [shape: f32[46,46], index: 1, kind: input, shape index: {}]   ;;  %s3241_s2 = inlined_call_operand.vmem [shape: f32[46,46], index: 2, kind: input, shape index: {}]   ;;  %s3242_s3 = inlined_call_operand.vmem [shape: f32[3,4,8], index: 3, kind: input, shape index: {}]   ;;  %s3243_s4 = inlined_call_operand.vmem [shape: f32[1,8], index: 4, kind: input, shape index: {}]   ;;  %s3244_s5 = inlined_call_operand.vmem [shape: f32[1,8], index: 5, kind: input, shape index: {}]   ;;  %s3245_s6 = inlined_call_operand.vmem [shape: f32[3,8,16], index: 6, kind: input, shape index: {}]   ;;  %s3246_s7 = inlined_call_operand.vmem [shape: f32[1,16], index: 7, kind: input, shape index: {}]   ;;  %s3247_s8 = inlined_call_operand.vmem [shape: f32[1,16], index: 8, kind: input, shape index: {}]   ;;  %s3248_s9 = inlined_call_operand.vmem [shape: f32[16,368], index: 9, kind: input, shape index: {}]   ;;  %s3249_s10 = inlined_call_operand.vmem [shape: f32[46,368], index: 10, kind: input, shape index: {}]   ;;  %s3250_s11 = inlined_call_operand.vmem [shape: f32[2,46], index: 11, kind: input, shape index: {}]   ;;  %s3251_s12 = inlined_call_operand.vmem [shape: f32[368,128], index: 12, kind: input, shape index: {}]   ;;  %s3252_s13 = inlined_call_operand.vmem [shape: f32[1,128], index: 13, kind: input, shape index: {}]   ;;  %s3253_s14 = inlined_call_operand.hbm [shape: f32[2,128], index: 14, kind: output, shape index: {}]  }
   0x1   :  { %v48_v0 = vld [vmem:[%s3239_s0] sm:$0xff]  ;;  %v49_v1 = vld [vmem:[%s3239_s0 + $0x8] sm:$0xff]  ;;  %v50_v2 = vld [vmem:[%s3239_s0 + $0x10] sm:$0xff] }
   0x2   :  { %v2443_v3 = vpack.c.bf16 %v49_v1, %v48_v0  ;;  %v51_v4 = vld [vmem:[%s3239_s0 + $0x18] sm:$0xff]  ;;  %v52_v6 = vld [vmem:[%s3239_s0 + $0x20] sm:$0xff]  ;;  %v53_v7 = vld [vmem:[%s3239_s0 + $0x28] sm:$0x3f] }
   0x3   :  { %v2447_v5 = vpack.c.bf16 %v51_v4, %v50_v2  ;;  %v54_v8 = vld [vmem:[%s3240_s1] sm:$0xff]  ;;  %v2451_v10 = vpack.c.bf16 %v53_v7, %v52_v6  ;;  %vm2748_vm3 = vmpackc.low %vm85_vm1, %vm2641_vm2 }
   0x4   :  { %2444 = vmatprep.subr.bf16.mxu0 %v2443_v3  ;;  %2246 = vmatprep.mubr.msk.f32.mxu0 %vm66_vm0, %v54_v8  ;;  %v2746_v9 = vld [vmem:[%s3241_s2] sm:$0xff] }
   0x5   :  { %2446 = vmatpush3.bf16.msra.mxu0 %v2443_v3  ;;  %2458 = vmatprep.subr.bf16.mxu1 %v2443_v3 }
   0x6   :  { %2448 = vmatprep.subr.bf16.mxu0 %v2447_v5  ;;  %2460 = vmatpush3.bf16.msra.mxu1 %v2443_v3 }
   0x7   :  { %2462 = vmatprep.subr.bf16.mxu1 %v2447_v5  ;;  %2267 = vmatprep.mubr.msk.f32.mxu1 %vm66_vm0, %v2746_v9 }
   0x8   :  { %19 = vsyncpa [#allocation3], 0  ;;  %v2001_v12 = vld [vmem:[%s3242_s3 + $0x4] sm:$0xf]  ;;  %vm318_vm4 = vcmask 1043456   ;;  %v2766_v13 = vld [vmem:[%s3240_s1 + $0x8] sm:$0xff] }
   0x9   :  { %2450 = vmatpush3.bf16.msra.mxu0 %v2447_v5  ;;  %v2771_v14 = vld [vmem:[%s3240_s1 + $0x10] sm:$0xff]  ;;  %v2778_v15 = vld [vmem:[%s3241_s2 + $0x8] sm:$0xff]  ;;  %v297_v17 = vld [vmem:[%s3242_s3] sm:$0xf]  ;;  %vm300_vm5 = vcmask 31744   ;;  %vm657_vm6 = vcmask 64512  }
   0xa   :  { %2453 = vmatprep.subr.msk.bf16.mxu0 %vm2748_vm3, %v2451_v10  ;;  %2464 = vmatpush3.bf16.msra.mxu1 %v2447_v5  ;;  %v2784_v16 = vld [vmem:[%s3241_s2 + $0x10] sm:$0xff]  ;;  %v2796_v18 = vld [vmem:[%s3240_s1 + $0x18] sm:$0xff]  ;;  %v2803_v19 = vld [vmem:[%s3240_s1 + $0x20] sm:$0xff]  ;;  %vm667_vm7 = vcmask 62464   ;;  %vm1282_vm8 = vcmask 130048   ;;  %vm1292_vm9 = vcmask 128000  }
   0xb   :  { %2467 = vmatprep.subr.msk.bf16.mxu1 %vm2748_vm3, %v2451_v10  ;;  %v2810_v20 = vld [vmem:[%s3241_s2 + $0x18] sm:$0xff]  ;;  %v2816_v21 = vld [vmem:[%s3241_s2 + $0x20] sm:$0xff]  ;;  %v2826_v22 = vld [vmem:[%s3240_s1 + $0x28] sm:$0x3f]  ;;  %vm2644_vm10 = vmmov 0   ;;  %vm1828_vm11 = vcmask 916480  }
   0xc   :  { %v2835_v23 = vld [vmem:[%s3241_s2 + $0x28] sm:$0x3f]  ;;  %v1783_v11 = vld [vmem:[%s3251_s12 + $0x40] sm:$0xff] }
   0xd   :  { %2456 = vmatpush3.bf16.msk.msra.mxu0 %vm2748_vm3, %v2451_v10  ;;  %v2016_v24 = vld [vmem:[%s3242_s3 + $0x8] sm:$0xf] }
   0xe   :  { %2470 = vmatpush3.bf16.msk.msra.mxu1 %vm2748_vm3, %v2451_v10  ;;  %2276 = vmatprep.subr.msk.mxu0 %vm318_vm4, %v2001_v12 }
  0x10   :  { %2247 = vmatmul.mubr.msk.f32.vlgmr.msra.gmra.mrb[0].mxu0 %vm66_vm0, %v2766_v13 }
  0x11   :  { %2249 = vmatprep.mubr.msk.f32.mxu0 %vm66_vm0, %v2771_v14  ;;  %2268 = vmatmul.mubr.msk.f32.vlgmr.msra.gmra.mrb[0].mxu1 %vm66_vm0, %v2778_v15 }
  0x12   :  { %2270 = vmatprep.mubr.msk.f32.mxu1 %vm66_vm0, %v2784_v16  ;;  %2277 = vmatpush3.msk.msra.mxu0 %vm318_vm4, %v2001_v12 }
  0x13   :  { %2287 = vmatprep.subr.msk.mxu0 %vm318_vm4, %v297_v17 }
  0x14   :  { %2250 = vmatmul.mubr.msk.f32.gmra.mrb[2].mxu0 %vm66_vm0, %v2796_v18 }
  0x15   :  { %2252 = vmatprep.mubr.msk.f32.mxu0 %vm66_vm0, %v2803_v19  ;;  %2271 = vmatmul.mubr.msk.f32.gmra.mrb[2].mxu1 %vm66_vm0, %v2810_v20 }
  0x16   :  { %2273 = vmatprep.mubr.msk.f32.mxu1 %vm66_vm0, %v2816_v21 }
  0x18   :  { %2253 = vmatmul.mubr.msk.f32.gmra.mrb[4].mxu0 %vm66_vm0, %v2826_v22 }
  0x19   :  { %2274 = vmatmul.mubr.msk.f32.gmra.mrb[4].mxu1 %vm66_vm0, %v2835_v23  ;;  %2278 = vmatprep.mubr.msk.f32.mxu0 %vm300_vm5, %v48_v0 }
  0x1a   :  { %2321 = vmatprep.mubr.msk.f32.mxu1 %vm66_vm0, %v54_v8 }
  0x1c   :  { %2279 = vmatmul.mubr.msk.f32.vlgmr.msra.gmra.mrb[6].mxu0 %vm300_vm5, %v49_v1 }
  0x1d   :  { %2288 = vmatpush3.msk.msra.mxu0 %vm318_vm4, %v297_v17  ;;  %2281 = vmatprep.mubr.msk.f32.mxu0 %vm300_vm5, %v50_v2 }
  0x1e   :  { %2298 = vmatprep.subr.msk.mxu0 %vm318_vm4, %v2016_v24 }
  0x20   :  { %2282 = vmatmul.mubr.msk.f32.gmra.mrb[8].mxu0 %vm300_vm5, %v51_v4 }
  0x21   :  { %2284 = vmatprep.mubr.msk.f32.mxu0 %vm300_vm5, %v52_v6 }
  0x24   :  { %2285 = vmatmul.mubr.msk.f32.gmra.mrb[10].mxu0 %vm300_vm5, %v53_v7 }
  0xe3   :  { %v2248_v25 = vpop.f32.mrb[0].mxu0 }
  0xe4   :  { %v155_v26 = vpop.f32.mrb[1].mxu0  ;;  %v2269_v27 = vpop.f32.mrb[0].mxu1 }
  0xe5   :  { %2289 = vmatprep.mubr.msk.f32.mxu0 %vm300_vm5, %v155_v26  ;;  %v268_v28 = vpop.f32.mrb[1].mxu1 }
  0xe6   :  { %2290 = vmatmul.mubr.msk.f32.vlgmr.msra.gmra.mrb[6].mxu0 %vm300_vm5, %v2248_v25 }
  0xe7   :  { %v2251_v29 = vpop.f32.mrb[2].mxu0  ;;  %2299 = vmatpush3.msk.msra.mxu0 %vm318_vm4, %v2016_v24 }
  0xe8   :  { %v165_v30 = vpop.f32.mrb[3].mxu0  ;;  %v2272_v31 = vpop.f32.mrb[2].mxu1 }
  0xe9   :  { %2292 = vmatprep.mubr.msk.f32.mxu0 %vm300_vm5, %v165_v30  ;;  %v278_v32 = vpop.f32.mrb[3].mxu1 }
  0xea   :  { %2293 = vmatmul.mubr.msk.f32.gmra.mrb[8].mxu0 %vm300_vm5, %v2251_v29 }
  0xeb   :  { %v2254_v33 = vpop.f32.mrb[4].mxu0 }
  0xec   :  { %v175_v34 = vpop.f32.mrb[5].mxu0  ;;  %v2275_v35 = vpop.f32.mrb[4].mxu1 }
  0xed   :  { %2295 = vmatprep.mubr.msk.f32.mxu0 %vm300_vm5, %v175_v34  ;;  %v288_v36 = vpop.f32.mrb[5].mxu1 }
  0xee   :  { %2296 = vmatmul.mubr.msk.f32.gmra.mrb[10].mxu0 %vm300_vm5, %v2254_v33 }
  0xef   :  { %2300 = vmatprep.mubr.msk.f32.mxu0 %vm300_vm5, %v268_v28 }
  0xf2   :  { %2301 = vmatmul.mubr.msk.f32.vlgmr.msra.gmra.mrb[6].mxu0 %vm300_vm5, %v2269_v27 }
  0xf3   :  { %2303 = vmatprep.mubr.msk.f32.mxu0 %vm300_vm5, %v278_v32 }
  0xf6   :  { %2304 = vmatmul.mubr.msk.f32.gmra.mrb[8].mxu0 %vm300_vm5, %v2272_v31 }
  0xf7   :  { %2306 = vmatprep.mubr.msk.f32.mxu0 %vm300_vm5, %v288_v36 }
  0xfa   :  { %2307 = vmatmul.mubr.msk.f32.gmra.mrb[10].mxu0 %vm300_vm5, %v2275_v35 }
 0x1c5   :  { %v2302_v37 = vpop.f32.mrb[6].mxu0 }
 0x1c6   :  { %v659_v38 = vsel %vm657_vm6, %v2302_v37, 0.0  ;;  %v622_v39 = vpop.f32.mrb[7].mxu0 }
 0x1c7   :  { %v658_v40 = vsel %vm657_vm6, %v622_v39, 0.0 }
 0x1c8   :  { %v660_v41 = vadd.f32 %v659_v38, %v658_v40  ;;  %v711_v40 = vlaneseq }
 0x1c9   :  { %v2305_v42 = vpop.f32.mrb[8].mxu0 }
 0x1ca   :  { %v632_v43 = vpop.f32.mrb[9].mxu0  ;;  %v663_v46 = vsel %vm657_vm6, %v2305_v42, 0.0 }
 0x1cb   :  { %v661_v44 = vsel %vm657_vm6, %v632_v43, 0.0 }
 0x1cc   :  { %v662_v45 = vadd.f32 %v661_v44, %v660_v41  ;;  %v2878_v41 = vshrl.u32 %v711_v40, 7 }
 0x1cd   :  { %v2308_v47 = vpop.f32.mrb[10].mxu0 }
 0x1ce   :  { %v642_v48 = vpop.f32.mrb[11].mxu0  ;;  %v664_v49 = vadd.f32 %v663_v46, %v662_v45  ;;  %v668_v52 = vsel %vm667_vm7, %v2308_v47, 0.0 }
 0x1cf   :  { %v665_v50 = vsel %vm657_vm6, %v642_v48, 0.0 }
 0x1d0   :  { %v666_v51 = vadd.f32 %v665_v50, %v664_v49 }
 0x1d2   :  { %v669_v53 = vadd.f32 %v668_v52, %v666_v51 }
 0x1d4   :  { %v670_v54 = vrot.slane %v669_v53, 4 }
 0x1d6   :  { %v671_v55 = vadd.f32 %v670_v54, %v669_v53 }
 0x1d8   :  { %v672_v56 = vrot.slane %v671_v55, 2 }
 0x1da   :  { %v673_v57 = vadd.f32 %v672_v56, %v671_v55 }
 0x1dc   :  { %v674_v58 = vrot.slane %v673_v57, 1 }
 0x1de   :  { %v675_v59 = vadd.f32 %v674_v58, %v673_v57 }
 0x1e0   :  { %v676_v60 = vmul.f32 0.02173913, %v675_v59 }
 0x1e2   :  { %v677_v61 = vsub.f32 %v622_v39, %v676_v60  ;;  %v678_v62 = vsub.f32 %v2302_v37, %v676_v60  ;;  %v679_v63 = vsub.f32 %v632_v43, %v676_v60  ;;  %v680_v0 = vsub.f32 %v2305_v42, %v676_v60  ;;  %v709_v42 = vld [vmem:[%s3243_s4] sm:$0x1] }
 0x1e3   :  { %v681_v1 = vsub.f32 %v642_v48, %v676_v60  ;;  %v682_v2 = vsub.f32 %v2308_v47, %v676_v60  ;;  %v713_v43 = vsub.s32 0, %v2878_v41  ;;  %v2024_v47 = vld [vmem:[%s3244_s5] ss:$0 sm:$0xff] }
 0x1e4   :  { %v683_v3 = vmul.f32 %v677_v61, %v677_v61  ;;  %v684_v4 = vmul.f32 %v678_v62, %v678_v62  ;;  %v685_v5 = vmul.f32 %v679_v63, %v679_v63  ;;  %v686_v6 = vmul.f32 %v680_v0, %v680_v0 }
 0x1e5   :  { %v687_v12 = vmul.f32 %v681_v1, %v681_v1  ;;  %v688_v25 = vmul.f32 %v682_v2, %v682_v2 }
 0x1e6   :  { %v689_v7 = vsel %vm657_vm6, %v683_v3, 0.0  ;;  %v690_v8 = vsel %vm657_vm6, %v684_v4, 0.0  ;;  %v692_v17 = vsel %vm657_vm6, %v685_v5, 0.0  ;;  %v694_v26 = vsel %vm657_vm6, %v686_v6, 0.0 }
 0x1e7   :  { %v691_v10 = vadd.f32 %v690_v8, %v689_v7  ;;  %v696_v28 = vsel %vm657_vm6, %v687_v12, 0.0  ;;  %v698_v30 = vsel %vm667_vm7, %v688_v25, 0.0  ;;  %v1369_v12 = vld [vmem:[%s3248_s9 + $0x20] sm:$0xff]  ;;  %v1368_v25 = vld [vmem:[%s3248_s9 + $0x18] sm:$0xff] }
 0x1e9   :  { %v693_v24 = vadd.f32 %v692_v17, %v691_v10 }
 0x1eb   :  { %v695_v27 = vadd.f32 %v694_v26, %v693_v24  ;;  %v1365_v24 = vld [vmem:[%s3248_s9] sm:$0xff] }
 0x1ec   :  { %v2501_v26 = vpack.c.bf16 %v1368_v25, %v1365_v24  ;;  %v1334_v25 = vld [vmem:[%s3246_s7] sm:$0x1] }
 0x1ed   :  { %v697_v29 = vadd.f32 %v696_v28, %v695_v27  ;;  %v2642_v27 = vmov 0.0   ;;  %v1367_v28 = vld [vmem:[%s3248_s9 + $0x10] sm:$0xff] }
 0x1ee   :  { %1453 = vmatprep.mubr.f32.mxu0 %v2642_v27 }
 0x1ef   :  { %v699_v31 = vadd.f32 %v698_v30, %v697_v29  ;;  %v1370_v29 = vld [vmem:[%s3248_s9 + $0x28] sm:$0xff] }
 0x1f0   :  { %v2966_v30 = vpack.c.bf16 %v1370_v29, %v1367_v28 }
 0x1f1   :  { %v700_v32 = vrot.slane %v699_v31, 4 }
 0x1f3   :  { %v701_v33 = vadd.f32 %v700_v32, %v699_v31 }
 0x1f5   :  { %v702_v34 = vrot.slane %v701_v33, 2 }
 0x1f7   :  { %v703_v35 = vadd.f32 %v702_v34, %v701_v33 }
 0x1f9   :  { %v704_v36 = vrot.slane %v703_v35, 1 }
 0x1fb   :  { %v705_v37 = vadd.f32 %v704_v36, %v703_v35 }
 0x1fd   :  { %v706_v38 = vmul.f32 0.02173913, %v705_v37 }
 0x1ff   :  { %v707_v39 = vadd.f32 1e-05, %v706_v38 }
 0x201   :  { %2613 = vrsqrt.f32 %v707_v39 }
 0x20b   :  { %v2614_v44 = vpop.eup %2613 }
 0x20c   :  { %v710_v45 = vmul.f32 %v2614_v44, %v709_v42 }
 0x20e   :  { %v714_v46 = vrot.slane %v710_v45, %v713_v43 }
 0x210   :  { %v719_v48 = vmul.f32 %v714_v46, %v681_v1  ;;  %v715_v49 = vmul.f32 %v714_v46, %v677_v61  ;;  %v716_v50 = vmul.f32 %v714_v46, %v678_v62  ;;  %v717_v51 = vmul.f32 %v714_v46, %v679_v63  ;;  %v2039_v61 = vld [vmem:[%s3245_s6 + $0x8] sm:$0xff] }
 0x211   :  { %v718_v52 = vmul.f32 %v714_v46, %v680_v0  ;;  %v720_v53 = vmul.f32 %v714_v46, %v682_v2  ;;  %v1366_v2 = vld [vmem:[%s3248_s9 + $0x8] sm:$0xff] }
 0x212   :  { %v732_v54 = vadd.f32 %v2024_v47, %v719_v48  ;;  %v728_v55 = vadd.f32 %v2024_v47, %v715_v49  ;;  %v729_v56 = vadd.f32 %v2024_v47, %v716_v50  ;;  %v730_v57 = vadd.f32 %v2024_v47, %v717_v51 }
 0x213   :  { %v731_v58 = vadd.f32 %v2024_v47, %v718_v52  ;;  %v733_v59 = vadd.f32 %v2024_v47, %v720_v53  ;;  %v2499_v17 = vpack.c.bf16 %v1369_v12, %v1366_v2 }
 0x214   :  { %v738_v60 = vmax.f32 %v732_v54, 0.0  ;;  %v734_v3 = vmax.f32 %v728_v55, 0.0  ;;  %v735_v4 = vmax.f32 %v729_v56, 0.0  ;;  %v736_v5 = vmax.f32 %v730_v57, 0.0 }
 0x215   :  { %v737_v6 = vmax.f32 %v731_v58, 0.0  ;;  %v739_v7 = vmax.f32 %v733_v59, 0.0  ;;  %2500 = vmatprep.subr.bf16.mxu0 %v2499_v17 }
 0x216   :  { %v2471_v8 = vpack.c.bf16 %v735_v4, %v734_v3  ;;  %2502 = vmatpush1.bf16.msra.mxu0 %v2501_v26 }
 0x217   :  { %v2475_v10 = vpack.c.bf16 %v737_v6, %v736_v5  ;;  %v2479_v1 = vpack.c.bf16 %v739_v7, %v738_v60  ;;  %2504 = vmatprep.subr.bf16.mxu0 %v2966_v30 }
 0x218   :  { %2472 = vmatprep.subr.bf16.mxu1 %v2471_v8 }
 0x219   :  { %2474 = vmatpush3.bf16.msra.mxu1 %v2471_v8 }
 0x21a   :  { %2476 = vmatprep.subr.bf16.mxu1 %v2475_v10 }
 0x21d   :  { %2478 = vmatpush3.bf16.msra.mxu1 %v2475_v10 }
 0x21e   :  { %2481 = vmatprep.subr.msk.bf16.mxu1 %vm2748_vm3, %v2479_v1 }
 0x221   :  { %2484 = vmatpush3.bf16.msk.msra.mxu1 %vm2748_vm3, %v2479_v1 }
 0x222   :  { %2486 = vmatprep.subr.bf16.mxu1 %v2471_v8 }
 0x224   :  { %2322 = vmatmul.mubr.msk.f32.vlgmr.msra.gmra.mrb[6].mxu1 %vm66_vm0, %v2766_v13  ;;  %v933_v13 = vld [vmem:[%s3245_s6] sm:$0xff] }
 0x225   :  { %2488 = vmatpush3.bf16.msra.mxu1 %v2471_v8  ;;  %2324 = vmatprep.mubr.msk.f32.mxu1 %vm66_vm0, %v2771_v14 }
 0x226   :  { %2490 = vmatprep.subr.bf16.mxu1 %v2475_v10 }
 0x228   :  { %2325 = vmatmul.mubr.msk.f32.gmra.mrb[8].mxu1 %vm66_vm0, %v2796_v18 }
 0x229   :  { %2492 = vmatpush3.bf16.msra.mxu1 %v2475_v10  ;;  %2327 = vmatprep.mubr.msk.f32.mxu1 %vm66_vm0, %v2803_v19 }
 0x22a   :  { %2495 = vmatprep.subr.msk.bf16.mxu1 %vm2748_vm3, %v2479_v1 }
 0x22c   :  { %2328 = vmatmul.mubr.msk.f32.gmra.mrb[10].mxu1 %vm66_vm0, %v2826_v22 }
 0x22d   :  { %2498 = vmatpush3.bf16.msk.msra.mxu1 %vm2748_vm3, %v2479_v1  ;;  %2342 = vmatprep.mubr.msk.f32.mxu1 %vm66_vm0, %v2746_v9  ;;  %v2052_v9 = vld [vmem:[%s3245_s6 + $0x10] sm:$0xff] }
 0x22e   :  { %2351 = vmatprep.subr.mxu1 %v2039_v61 }
 0x230   :  { %2343 = vmatmul.mubr.msk.f32.vlgmr.msra.gmra.mrb[12].mxu1 %vm66_vm0, %v2778_v15 }
 0x231   :  { %2345 = vmatprep.mubr.msk.f32.mxu1 %vm66_vm0, %v2784_v16  ;;  %2352 = vmatpush3.msra.mxu1 %v2039_v61 }
 0x232   :  { %2362 = vmatprep.subr.mxu1 %v933_v13 }
 0x234   :  { %2346 = vmatmul.mubr.msk.f32.gmra.mrb[14].mxu1 %vm66_vm0, %v2810_v20 }
 0x235   :  { %2348 = vmatprep.mubr.msk.f32.mxu1 %vm66_vm0, %v2816_v21 }
 0x238   :  { %2349 = vmatmul.mubr.msk.f32.gmra.mrb[16].mxu1 %vm66_vm0, %v2835_v23 }
 0x239   :  { %2353 = vmatprep.mubr.msk.f32.mxu1 %vm657_vm6, %v734_v3 }
 0x23c   :  { %2354 = vmatmul.mubr.msk.f32.vlgmr.msra.gmra.mrb[18].mxu1 %vm657_vm6, %v735_v4 }
 0x23d   :  { %2356 = vmatprep.mubr.msk.f32.mxu1 %vm657_vm6, %v736_v5  ;;  %2363 = vmatpush3.msra.mxu1 %v933_v13 }
 0x23e   :  { %2373 = vmatprep.subr.mxu1 %v2052_v9 }
 0x240   :  { %2357 = vmatmul.mubr.msk.f32.gmra.mrb[20].mxu1 %vm657_vm6, %v737_v6 }
 0x241   :  { %2359 = vmatprep.mubr.msk.f32.mxu1 %vm657_vm6, %v738_v60 }
 0x244   :  { %2360 = vmatmul.mubr.msk.f32.gmra.mrb[22].mxu1 %vm657_vm6, %v739_v7 }
 0x2f7   :  { %v2323_v14 = vpop.f32.mrb[6].mxu1 }
 0x2f8   :  { %v809_v15 = vpop.f32.mrb[7].mxu1 }
 0x2f9   :  { %2364 = vmatprep.mubr.msk.f32.mxu1 %vm657_vm6, %v809_v15 }
 0x2fa   :  { %2365 = vmatmul.mubr.msk.f32.vlgmr.msra.gmra.mrb[18].mxu1 %vm657_vm6, %v2323_v14 }
 0x2fb   :  { %v2326_v16 = vpop.f32.mrb[8].mxu1  ;;  %2374 = vmatpush3.msra.mxu1 %v2052_v9 }
 0x2fc   :  { %v819_v18 = vpop.f32.mrb[9].mxu1 }
 0x2fd   :  { %2367 = vmatprep.mubr.msk.f32.mxu1 %vm657_vm6, %v819_v18 }
 0x2fe   :  { %2368 = vmatmul.mubr.msk.f32.gmra.mrb[20].mxu1 %vm657_vm6, %v2326_v16 }
 0x2ff   :  { %v2329_v19 = vpop.f32.mrb[10].mxu1 }
 0x300   :  { %v829_v20 = vpop.f32.mrb[11].mxu1 }
 0x301   :  { %2370 = vmatprep.mubr.msk.f32.mxu1 %vm657_vm6, %v829_v20 }
 0x302   :  { %2371 = vmatmul.mubr.msk.f32.gmra.mrb[22].mxu1 %vm657_vm6, %v2329_v19 }
 0x303   :  { %v2344_v21 = vpop.f32.mrb[12].mxu1 }
 0x304   :  { %v904_v22 = vpop.f32.mrb[13].mxu1 }
 0x305   :  { %2375 = vmatprep.mubr.msk.f32.mxu1 %vm657_vm6, %v904_v22 }
 0x306   :  { %2376 = vmatmul.mubr.msk.f32.vlgmr.msra.gmra.mrb[18].mxu1 %vm657_vm6, %v2344_v21 }
 0x307   :  { %v2347_v23 = vpop.f32.mrb[14].mxu1 }
 0x308   :  { %v914_v62 = vpop.f32.mrb[15].mxu1 }
 0x309   :  { %2378 = vmatprep.mubr.msk.f32.mxu1 %vm657_vm6, %v914_v62 }
 0x30a   :  { %2379 = vmatmul.mubr.msk.f32.gmra.mrb[20].mxu1 %vm657_vm6, %v2347_v23 }
 0x30b   :  { %v2350_v63 = vpop.f32.mrb[16].mxu1 }
 0x30c   :  { %v924_v0 = vpop.f32.mrb[17].mxu1 }
 0x30d   :  { %2381 = vmatprep.mubr.msk.f32.mxu1 %vm657_vm6, %v924_v0 }
 0x30e   :  { %2382 = vmatmul.mubr.msk.f32.gmra.mrb[22].mxu1 %vm657_vm6, %v2350_v63 }
 0x30f   :  { %1698 = vmatprep.mubr.f32.mxu1 %v2642_v27 }
 0x3d9   :  { %v2377_v31 = vpop.f32.mrb[18].mxu1 }
 0x3da   :  { %v1284_v32 = vsel %vm1282_vm8, %v2377_v31, 0.0  ;;  %v1247_v33 = vpop.f32.mrb[19].mxu1 }
 0x3db   :  { %v1283_v34 = vsel %vm1282_vm8, %v1247_v33, 0.0 }
 0x3dc   :  { %v1285_v35 = vadd.f32 %v1284_v32, %v1283_v34 }
 0x3dd   :  { %v2380_v36 = vpop.f32.mrb[20].mxu1 }
 0x3de   :  { %v1257_v37 = vpop.f32.mrb[21].mxu1  ;;  %v1288_v40 = vsel %vm1282_vm8, %v2380_v36, 0.0 }
 0x3df   :  { %v1286_v38 = vsel %vm1282_vm8, %v1257_v37, 0.0 }
 0x3e0   :  { %v1287_v39 = vadd.f32 %v1286_v38, %v1285_v35 }
 0x3e1   :  { %v2383_v42 = vpop.f32.mrb[22].mxu1 }
 0x3e2   :  { %v1267_v44 = vpop.f32.mrb[23].mxu1  ;;  %v1289_v45 = vadd.f32 %v1288_v40, %v1287_v39  ;;  %v1293_v48 = vsel %vm1292_vm9, %v2383_v42, 0.0 }
 0x3e3   :  { %v1290_v46 = vsel %vm1282_vm8, %v1267_v44, 0.0 }
 0x3e4   :  { %v1291_v47 = vadd.f32 %v1290_v46, %v1289_v45 }
 0x3e6   :  { %v1294_v49 = vadd.f32 %v1293_v48, %v1291_v47 }
 0x3e8   :  { %v1295_v50 = vrot.slane %v1294_v49, 4 }
 0x3ea   :  { %v1296_v51 = vadd.f32 %v1295_v50, %v1294_v49  ;;  %v2643_v49 = vmov 0.0|0.0  }
 0x3ec   :  { %v1297_v52 = vrot.slane %v1296_v51, 2 }
 0x3ee   :  { %v1298_v53 = vadd.f32 %v1297_v52, %v1296_v51  ;;  %v1586_v52 = vld [vmem:[%s3249_s10] sm:$0xff] }
 0x3f0   :  { %v1299_v54 = vrot.slane %v1298_v53, 1 }
 0x3f2   :  { %v1300_v55 = vadd.f32 %v1299_v54, %v1298_v53  ;;  %v1589_v53 = vld [vmem:[%s3249_s10 + $0x18] sm:$0xff]  ;;  %v1587_v54 = vld [vmem:[%s3249_s10 + $0x8] sm:$0xff] }
 0x3f4   :  { %v1301_v56 = vmul.f32 0.02173913, %v1300_v55  ;;  %v1590_v55 = vld [vmem:[%s3249_s10 + $0x20] sm:$0xff] }
 0x3f6   :  { %v1302_v57 = vsub.f32 %v1247_v33, %v1301_v56  ;;  %v1303_v58 = vsub.f32 %v2377_v31, %v1301_v56  ;;  %v1304_v59 = vsub.f32 %v1257_v37, %v1301_v56  ;;  %v1305_v60 = vsub.f32 %v2380_v36, %v1301_v56  ;;  %v2059_v31 = vld [vmem:[%s3247_s8] ss:$0 sm:$0xff] }
 0x3f7   :  { %v1306_v3 = vsub.f32 %v1267_v44, %v1301_v56  ;;  %v1307_v4 = vsub.f32 %v2383_v42, %v1301_v56 }
 0x3f8   :  { %v1308_v5 = vmul.f32 %v1302_v57, %v1302_v57  ;;  %v1309_v6 = vmul.f32 %v1303_v58, %v1303_v58  ;;  %v1310_v7 = vmul.f32 %v1304_v59, %v1304_v59  ;;  %v1311_v8 = vmul.f32 %v1305_v60, %v1305_v60 }
 0x3f9   :  { %v1312_v13 = vmul.f32 %v1306_v3, %v1306_v3  ;;  %v1313_v15 = vmul.f32 %v1307_v4, %v1307_v4 }
 0x3fa   :  { %v1314_v10 = vsel %vm1282_vm8, %v1308_v5, 0.0  ;;  %v1315_v1 = vsel %vm1282_vm8, %v1309_v6, 0.0  ;;  %v1317_v9 = vsel %vm1282_vm8, %v1310_v7, 0.0  ;;  %v1319_v16 = vsel %vm1282_vm8, %v1311_v8, 0.0  ;;  %v1592_v8 = vld [vmem:[%s3249_s10 + $0x30] sm:$0xff] }
 0x3fb   :  { %v1316_v61 = vadd.f32 %v1315_v1, %v1314_v10  ;;  %v1321_v19 = vsel %vm1282_vm8, %v1312_v13, 0.0  ;;  %v1323_v21 = vsel %vm1292_vm9, %v1313_v15, 0.0  ;;  %v1595_v10 = vld [vmem:[%s3249_s10 + $0x48] sm:$0xff]  ;;  %v1593_v1 = vld [vmem:[%s3249_s10 + $0x38] sm:$0xff] }
 0x3fd   :  { %v1318_v14 = vadd.f32 %v1317_v9, %v1316_v61  ;;  %v1596_v61 = vld [vmem:[%s3249_s10 + $0x50] sm:$0xff] }
 0x3ff   :  { %v1320_v18 = vadd.f32 %v1319_v16, %v1318_v14 }
 0x401   :  { %v1322_v20 = vadd.f32 %v1321_v19, %v1320_v18 }
 0x403   :  { %v1324_v22 = vadd.f32 %v1323_v21, %v1322_v20 }
 0x405   :  { %v1325_v23 = vrot.slane %v1324_v22, 4 }
 0x407   :  { %v1326_v62 = vadd.f32 %v1325_v23, %v1324_v22  ;;  %v1598_v23 = vld [vmem:[%s3249_s10 + $0x60] sm:$0xff] }
 0x409   :  { %v1327_v63 = vrot.slane %v1326_v62, 2 }
 0x40b   :  { %v1328_v0 = vadd.f32 %v1327_v63, %v1326_v62  ;;  %v1601_v62 = vld [vmem:[%s3249_s10 + $0x78] sm:$0x3f]  ;;  %v1599_v63 = vld [vmem:[%s3249_s10 + $0x68] sm:$0xff] }
 0x40d   :  { %v1329_v2 = vrot.slane %v1328_v0, 1 }
 0x40f   :  { %v1330_v12 = vadd.f32 %v1329_v2, %v1328_v0  ;;  %v1602_v0 = vld [vmem:[%s3249_s10 + $0x80] sm:$0x3f] }
 0x411   :  { %v1331_v17 = vmul.f32 0.02173913, %v1330_v12 }
 0x413   :  { %v1332_v24 = vadd.f32 1e-05, %v1331_v17 }
 0x415   :  { %2615 = vrsqrt.f32 %v1332_v24 }
 0x41f   :  { %v2616_v26 = vpop.eup %2615 }
 0x420   :  { %v1335_v28 = vmul.f32 %v2616_v26, %v1334_v25  ;;  %v1791_v25 = vld [vmem:[%s3251_s12 + $0x80] sm:$0xff]  ;;  %v1792_v26 = vld [vmem:[%s3251_s12 + $0x88] sm:$0xff] }
 0x422   :  { %v1339_v29 = vrot.slane %v1335_v28, %v713_v43 }
 0x424   :  { %v1340_v32 = vmul.f32 %v1339_v29, %v1302_v57  ;;  %v1344_v33 = vmul.f32 %v1339_v29, %v1306_v3  ;;  %v1341_v34 = vmul.f32 %v1339_v29, %v1303_v58  ;;  %v1342_v35 = vmul.f32 %v1339_v29, %v1304_v59 }
 0x425   :  { %v1343_v36 = vmul.f32 %v1339_v29, %v1305_v60  ;;  %v1345_v37 = vmul.f32 %v1339_v29, %v1307_v4 }
 0x426   :  { %v1353_v38 = vadd.f32 %v2059_v31, %v1340_v32  ;;  %v1354_v40 = vadd.f32 %v2059_v31, %v1341_v34  ;;  %v1355_v43 = vadd.f32 %v2059_v31, %v1342_v35  ;;  %v1357_v45 = vadd.f32 %v2059_v31, %v1344_v33  ;;  %v1588_v33 = vld [vmem:[%s3249_s10 + $0x10] sm:$0xff] }
 0x427   :  { %v1356_v44 = vadd.f32 %v2059_v31, %v1343_v36  ;;  %v1358_v47 = vadd.f32 %v2059_v31, %v1345_v37  ;;  %v1591_v31 = vld [vmem:[%s3249_s10 + $0x28] sm:$0xff]  ;;  %v2531_v36 = vpack.c.bf16 %v1792_v26, %v1791_v25  ;;  %v1775_v37 = vld [vmem:[%s3251_s12] sm:$0xff] }
 0x428   :  { %v1359_v39 = vmax.f32 %v1353_v38, 0.0  ;;  %v1360_v41 = vmax.f32 %v1354_v40, 0.0  ;;  %v1361_v42 = vmax.f32 %v1355_v43, 0.0  ;;  %v1776_v38 = vld [vmem:[%s3251_s12 + $0x8] sm:$0xff]  ;;  %v1794_v43 = vld [vmem:[%s3251_s12 + $0x98] sm:$0xff] }
 0x429   :  { %v1362_v46 = vmax.f32 %v1356_v44, 0.0  ;;  %v1364_v48 = vmax.f32 %v1358_v47, 0.0  ;;  %v1597_v44 = vld [vmem:[%s3249_s10 + $0x58] sm:$0xff] }
 0x42a   :  { %2060 = vmatmul.mubr.msk.f32.vlgmr.msra.gmra.mrb[12].mxu0 %vm1282_vm8, %v1359_v39 }
 0x42b   :  { %2506 = vmatpush3.bf16.msra.mxu0 %v2966_v30  ;;  %1459 = vmatprep.mubr.f32.mxu0 %v2642_v27  ;;  %v1363_v30 = vmax.f32 %v1357_v45, 0.0  ;;  %v1594_v45 = vld [vmem:[%s3249_s10 + $0x40] sm:$0xff] }
 0x42c   :  { %2521 = vmatprep.subr.bf16.mxu0 %v2643_v49 }
 0x42e   :  { %2061 = vmatmul.mubr.msk.f32.gmra.mrb[14].mxu0 %vm1282_vm8, %v1360_v41 }
 0x42f   :  { %1465 = vmatprep.mubr.f32.mxu0 %v2642_v27 }
 0x432   :  { %2062 = vmatmul.mubr.msk.f32.gmra.mrb[16].mxu0 %vm1282_vm8, %v1361_v42 }
 0x433   :  { %1471 = vmatprep.mubr.f32.mxu0 %v2642_v27 }
 0x436   :  { %2063 = vmatmul.mubr.msk.f32.gmra.mrb[18].mxu0 %vm1282_vm8, %v1362_v46 }
 0x437   :  { %1477 = vmatprep.mubr.f32.mxu0 %v2642_v27 }
 0x43a   :  { %2064 = vmatmul.mubr.msk.f32.gmra.mrb[20].mxu0 %vm1282_vm8, %v1363_v30 }
 0x43b   :  { %1483 = vmatprep.mubr.f32.mxu0 %v2642_v27 }
 0x43e   :  { %2065 = vmatmul.mubr.msk.f32.gmra.mrb[22].mxu0 %vm1282_vm8, %v1364_v48 }
 0x43f   :  { %2388 = vmatprep.mubr.msk.f32.mxu0 %vm1282_vm8, %v1359_v39 }
 0x442   :  { %2389 = vmatmul.mubr.msk.f32.vlgmr.msra.gmra.mrb[24].mxu0 %vm1282_vm8, %v1360_v41  ;;  %v1793_v41 = vld [vmem:[%s3251_s12 + $0x90] sm:$0xff] }
 0x443   :  { %2391 = vmatprep.mubr.msk.f32.mxu0 %vm1282_vm8, %v1361_v42 }
 0x446   :  { %2392 = vmatmul.mubr.msk.f32.gmra.mrb[26].mxu0 %vm1282_vm8, %v1362_v46  ;;  %v1585_v46 = vld [vmem:[%s3250_s11] sm:$0x3] }
 0x447   :  { %2394 = vmatprep.mubr.msk.f32.mxu0 %vm1282_vm8, %v1363_v30  ;;  %v2533_v30 = vpack.c.bf16 %v1776_v38, %v1775_v37  ;;  %v1813_v37 = vld [vmem:[%s3251_s12 + $0x130] sm:$0xff]  ;;  %v1814_v38 = vld [vmem:[%s3251_s12 + $0x138] sm:$0xff] }
 0x44a   :  { %2395 = vmatmul.mubr.msk.f32.gmra.mrb[28].mxu0 %vm1282_vm8, %v1364_v48 }
 0x44b   :  { %2409 = vmatprep.mubr.msk.f32.mxu0 %vm2644_vm10, %v2642_v27 }
 0x4fd   :  { %v1455_v50 = vpop.f32.mrb[12].mxu0 }
 0x4fe   :  { %v1457_v51 = vpop.f32.mrb[13].mxu0  ;;  %v1604_v57 = vmul.f32 %v1586_v52, %v1455_v50  ;;  %v2535_v50 = vpack.c.bf16 %v1794_v43, %v1793_v41  ;;  %v1778_v52 = vld [vmem:[%s3251_s12 + $0x18] sm:$0xff]  ;;  %v1788_v41 = vld [vmem:[%s3251_s12 + $0x68] sm:$0xff]  ;;  %v1805_v43 = vld [vmem:[%s3251_s12 + $0xf0] sm:$0xff] }
 0x4ff   :  { %v1605_v60 = vmul.f32 %v1587_v54, %v1457_v51  ;;  %v1777_v51 = vld [vmem:[%s3251_s12 + $0x10] sm:$0xff] }
 0x501   :  { %v1461_v56 = vpop.f32.mrb[14].mxu0 }
 0x502   :  { %v1607_v58 = vmul.f32 %v1589_v53, %v1461_v56  ;;  %v1463_v59 = vpop.f32.mrb[15].mxu0  ;;  %v1796_v56 = vld [vmem:[%s3251_s12 + $0xa8] sm:$0xff] }
 0x503   :  { %v1608_v3 = vmul.f32 %v1590_v55, %v1463_v59  ;;  %v1795_v55 = vld [vmem:[%s3251_s12 + $0xa0] sm:$0xff]  ;;  %v1600_v59 = vld [vmem:[%s3249_s10 + $0x70] sm:$0xff] }
 0x504   :  { %v2509_v4 = vpack.c.bf16 %v1607_v58, %v1604_v57  ;;  %v1603_v58 = vld [vmem:[%s3249_s10 + $0x88] sm:$0x3f] }
 0x505   :  { %v2507_v5 = vpack.c.bf16 %v1608_v3, %v1605_v60  ;;  %v1467_v6 = vpop.f32.mrb[16].mxu0  ;;  %v2537_v60 = vpack.c.bf16 %v1778_v52, %v1777_v51  ;;  %v1790_v51 = vld [vmem:[%s3251_s12 + $0x78] sm:$0xff] }
 0x506   :  { %v1469_v7 = vpop.f32.mrb[17].mxu0  ;;  %v1610_v9 = vmul.f32 %v1592_v8, %v1467_v6  ;;  %v1779_v6 = vld [vmem:[%s3251_s12 + $0x20] sm:$0xff] }
 0x507   :  { %2508 = vmatprep.subr.bf16.mxu1 %v2507_v5  ;;  %v1611_v16 = vmul.f32 %v1593_v1, %v1469_v7  ;;  %v2539_v5 = vpack.c.bf16 %v1796_v56, %v1795_v55  ;;  %v1780_v7 = vld [vmem:[%s3251_s12 + $0x28] sm:$0xff]  ;;  %v1797_v1 = vld [vmem:[%s3251_s12 + $0xb0] sm:$0xff]  ;;  %v1819_v55 = vld [vmem:[%s3251_s12 + $0x160] sm:$0xff] }
 0x508   :  { %2510 = vmatpush1.bf16.msra.mxu1 %v2509_v4 }
 0x509   :  { %v1473_v13 = vpop.f32.mrb[18].mxu0 }
 0x50a   :  { %v1613_v14 = vmul.f32 %v1595_v10, %v1473_v13  ;;  %v1475_v15 = vpop.f32.mrb[19].mxu0 }
 0x50b   :  { %v1614_v18 = vmul.f32 %v1596_v61, %v1475_v15  ;;  %v1798_v61 = vld [vmem:[%s3251_s12 + $0xb8] sm:$0xff]  ;;  %v1808_v15 = vld [vmem:[%s3251_s12 + $0x108] sm:$0xff] }
 0x50c   :  { %v2513_v19 = vpack.c.bf16 %v1613_v14, %v1610_v9  ;;  %v2541_v9 = vpack.c.bf16 %v1780_v7, %v1779_v6  ;;  %v1807_v14 = vld [vmem:[%s3251_s12 + $0x100] sm:$0xff] }
 0x50d   :  { %v2511_v20 = vpack.c.bf16 %v1614_v18, %v1611_v16  ;;  %v1479_v21 = vpop.f32.mrb[20].mxu0  ;;  %v2543_v18 = vpack.c.bf16 %v1798_v61, %v1797_v1 }
 0x50e   :  { %v1481_v22 = vpop.f32.mrb[21].mxu0  ;;  %v1616_v12 = vmul.f32 %v1598_v23, %v1479_v21  ;;  %v1799_v21 = vld [vmem:[%s3251_s12 + $0xc0] sm:$0xff]  ;;  %v2564_v23 = vpack.c.bf16 %v1808_v15, %v1807_v14 }
 0x50f   :  { %2512 = vmatprep.subr.bf16.mxu1 %v2511_v20  ;;  %v1617_v28 = vmul.f32 %v1599_v63, %v1481_v22  ;;  %v1782_v20 = vld [vmem:[%s3251_s12 + $0x38] sm:$0xff]  ;;  %v1800_v22 = vld [vmem:[%s3251_s12 + $0xc8] sm:$0xff]  ;;  %v1809_v63 = vld [vmem:[%s3251_s12 + $0x110] sm:$0xff] }
 0x510   :  { %2514 = vmatpush1.bf16.msra.mxu1 %v2513_v19  ;;  %v1781_v19 = vld [vmem:[%s3251_s12 + $0x30] sm:$0xff] }
 0x511   :  { %v1485_v2 = vpop.f32.mrb[22].mxu0 }
 0x512   :  { %v1619_v17 = vmul.f32 %v1601_v62, %v1485_v2  ;;  %v1487_v24 = vpop.f32.mrb[23].mxu0  ;;  %v2545_v62 = vpack.c.bf16 %v1782_v20, %v1781_v19  ;;  %v2547_v2 = vpack.c.bf16 %v1800_v22, %v1799_v21 }
 0x513   :  { %v1620_v29 = vmul.f32 %v1602_v0, %v1487_v24  ;;  %v1810_v0 = vld [vmem:[%s3251_s12 + $0x118] sm:$0xff] }
 0x514   :  { %v2518_v32 = vpack.c.bf16 %v1619_v17, %v1616_v12  ;;  %v1784_v12 = vld [vmem:[%s3251_s12 + $0x48] sm:$0xff]  ;;  %v1801_v17 = vld [vmem:[%s3251_s12 + $0xd0] sm:$0xff]  ;;  %v1802_v24 = vld [vmem:[%s3251_s12 + $0xd8] sm:$0xff]  ;;  %v2567_v25 = vpack.c.bf16 %v1810_v0, %v1809_v63 }
 0x515   :  { %v2515_v34 = vpack.c.bf16 %v1620_v29, %v1617_v28  ;;  %v2390_v35 = vpop.f32.mrb[24].mxu0  ;;  %v2549_v26 = vpack.c.bf16 %v1784_v12, %v1783_v11  ;;  %v1811_v28 = vld [vmem:[%s3251_s12 + $0x120] sm:$0xff]  ;;  %v1812_v29 = vld [vmem:[%s3251_s12 + $0x128] sm:$0xff] }
 0x516   :  { %v1609_v39 = vmul.f32 %v2390_v35, %v1591_v31  ;;  %v1556_v40 = vpop.f32.mrb[25].mxu0  ;;  %v2551_v31 = vpack.c.bf16 %v1802_v24, %v1801_v17  ;;  %v2570_v35 = vpack.c.bf16 %v1812_v29, %v1811_v28 }
 0x517   :  { %v1606_v42 = vmul.f32 %v1588_v33, %v1556_v40  ;;  %2517 = vmatprep.subr.msk.bf16.mxu1 %vm2748_vm3, %v2515_v34  ;;  %v1803_v33 = vld [vmem:[%s3251_s12 + $0xe0] sm:$0xff]  ;;  %v1804_v34 = vld [vmem:[%s3251_s12 + $0xe8] sm:$0xff] }
 0x518   :  { %2520 = vmatpush1.bf16.msk.msra.mxu1 %vm2748_vm3, %v2518_v32  ;;  %v1785_v32 = vld [vmem:[%s3251_s12 + $0x50] sm:$0xff]  ;;  %v1787_v40 = vld [vmem:[%s3251_s12 + $0x60] sm:$0xff] }
 0x519   :  { %v2522_v47 = vpack.c.bf16 %v1609_v39, %v1606_v42  ;;  %v2393_v48 = vpop.f32.mrb[26].mxu0  ;;  %2532 = vmatprep.subr.bf16.mxu1 %v2531_v36  ;;  %v2555_v39 = vpack.c.bf16 %v1804_v34, %v1803_v33  ;;  %v1806_v42 = vld [vmem:[%s3251_s12 + $0xf8] sm:$0xff] }
 0x51a   :  { %v1615_v53 = vmul.f32 %v2393_v48, %v1597_v44  ;;  %v1566_v54 = vpop.f32.mrb[27].mxu0  ;;  %v2573_v44 = vpack.c.bf16 %v1814_v38, %v1813_v37 }
 0x51b   :  { %v1612_v57 = vmul.f32 %v1594_v45, %v1566_v54  ;;  %2523 = vmatpush3.bf16.msra.mxu0 %v2522_v47  ;;  %2074 = vmatmul.mubr.msk.f32.vlgmr.msra.gmra.mrb[24].mxu1 %vm66_vm0, %v1585_v46  ;;  %v2557_v45 = vpack.c.bf16 %v1788_v41, %v1787_v40  ;;  %v2559_v47 = vpack.c.bf16 %v1806_v42, %v1805_v43  ;;  %v1818_v54 = vld [vmem:[%s3251_s12 + $0x158] sm:$0xff] }
 0x51c   :  { %2524 = vmatprep.subr.bf16.mxu0 %v2643_v49  ;;  %2534 = vmatpush3.bf16.msra.mxu1 %v2533_v30  ;;  %v1816_v30 = vld [vmem:[%s3251_s12 + $0x148] sm:$0xff] }
 0x51d   :  { %v2525_v3 = vpack.c.bf16 %v1615_v53, %v1612_v57  ;;  %v2396_v4 = vpop.f32.mrb[28].mxu0  ;;  %2536 = vmatprep.subr.bf16.mxu1 %v2535_v50  ;;  %v1789_v50 = vld [vmem:[%s3251_s12 + $0x70] sm:$0xff]  ;;  %v1820_v57 = vld [vmem:[%s3251_s12 + $0x168] sm:$0xff] }
 0x51e   :  { %v1621_v8 = vmul.f32 %v2396_v4, %v1603_v58  ;;  %v1576_v10 = vpop.f32.mrb[29].mxu0  ;;  %v2561_v52 = vpack.c.bf16 %v1790_v51, %v1789_v50  ;;  %v1817_v53 = vld [vmem:[%s3251_s12 + $0x150] sm:$0xff]  ;;  %v2582_v58 = vpack.c.bf16 %v1820_v57, %v1819_v55 }
 0x51f   :  { %v1618_v13 = vmul.f32 %v1600_v59, %v1576_v10  ;;  %2526 = vmatpush3.bf16.msra.mxu0 %v2525_v3  ;;  %v2579_v56 = vpack.c.bf16 %v1818_v54, %v1817_v53 }
 0x520   :  { %2527 = vmatprep.subr.bf16.mxu0 %v2643_v49  ;;  %2538 = vmatpush3.bf16.msra.mxu1 %v2537_v60 }
 0x521   :  { %v2528_v16 = vpack.c.bf16 %v1621_v8, %v1618_v13  ;;  %2540 = vmatprep.subr.bf16.mxu1 %v2539_v5  ;;  %v2077_v8 = vld [vmem:[%s3252_s13] ss:$0 sm:$0xff] }
 0x523   :  { %2530 = vmatpush3.bf16.msk.msra.mxu0 %vm2748_vm3, %v2528_v16 }
 0x524   :  { %2542 = vmatpush3.bf16.msra.mxu1 %v2541_v9  ;;  %2563 = vmatprep.subr.bf16.mxu0 %v2643_v49 }
 0x525   :  { %2544 = vmatprep.subr.bf16.mxu1 %v2543_v18 }
 0x526   :  { %2410 = vmatmul.mubr.msk.f32.vlgmr.msra.gmra.mrb[30].mxu0 %vm66_vm0, %v1585_v46  ;;  %v1815_v46 = vld [vmem:[%s3251_s12 + $0x140] sm:$0xff] }
 0x527   :  { %2565 = vmatpush3.bf16.msra.mxu0 %v2564_v23  ;;  %2440 = vmatprep.mubr.msk.f32.mxu0 %vm2644_vm10, %v2642_v27  ;;  %v1786_v27 = vld [vmem:[%s3251_s12 + $0x58] sm:$0xff]  ;;  %v2576_v48 = vpack.c.bf16 %v1816_v30, %v1815_v46  ;;  %s2645_s12 = smov [#allocation2]  }
 0x528   :  { %2546 = vmatpush3.bf16.msra.mxu1 %v2545_v62  ;;  %2566 = vmatprep.subr.bf16.mxu0 %v2643_v49  ;;  %v2553_v36 = vpack.c.bf16 %v1786_v27, %v1785_v32  ;;  %s1979_s9 = sshll.u32 %s2645_s12, 4  ;;  %s1980_s9 = int_to_ptr.vmem [resolvable:$true] %s1979_s9 }
 0x529   :  { %2548 = vmatprep.subr.bf16.mxu1 %v2547_v2  ;;  %s2617_s2 = scalar_lea.vmem %s1980_s9, 32  ;;  %p2622_p1 = scmp.lt.s32.totalorder %s1980_s9, %s1980_s9 }
 0x52a   :  { %p2618_p0 = scmp.ne.s32.totalorder %s1980_s9, %s2617_s2  ;;  %p2623_p2 = scmp.lt.s32.totalorder %s2617_s2, %s2617_s2 }
 0x52b   :  { %2568 = vmatpush3.bf16.msra.mxu0 %v2567_v25 }
 0x52c   :  { %2550 = vmatpush3.bf16.msra.mxu1 %v2549_v26  ;;  %2569 = vmatprep.subr.bf16.mxu0 %v2643_v49  ;;  %p2624_p3 = por %p2623_p2, %p2622_p1 }
 0x52d   :  { %2552 = vmatprep.subr.bf16.mxu1 %v2551_v31 }
 0x52e   :  { %p2625_p4 = pnand %p2624_p3, %p2618_p0 }
 0x52f   :  { %2571 = vmatpush3.bf16.msra.mxu0 %v2570_v35 }
 0x530   :  { %2554 = vmatpush3.bf16.msra.mxu1 %v2553_v36  ;;  %2572 = vmatprep.subr.bf16.mxu0 %v2643_v49 }
 0x531   :  { %2556 = vmatprep.subr.bf16.mxu1 %v2555_v39 }
 0x533   :  { %2574 = vmatpush3.bf16.msra.mxu0 %v2573_v44 }
 0x534   :  { %2558 = vmatpush3.bf16.msra.mxu1 %v2557_v45  ;;  %2575 = vmatprep.subr.bf16.mxu0 %v2643_v49 }
 0x535   :  { %2560 = vmatprep.subr.bf16.mxu1 %v2559_v47 }
 0x537   :  { %2577 = vmatpush3.bf16.msra.mxu0 %v2576_v48 }
 0x538   :  { %2578 = vmatprep.subr.bf16.mxu0 %v2643_v49  ;;  %2562 = vmatpush3.bf16.msra.mxu1 %v2561_v52 }
 0x53b   :  { %2580 = vmatpush3.bf16.msra.mxu0 %v2579_v56 }
 0x53c   :  { %2581 = vmatprep.subr.bf16.mxu0 %v2643_v49 }
 0x53f   :  { %2583 = vmatpush3.bf16.msra.mxu0 %v2582_v58 }
 0x5ee   :  { %v1700_v59 = vpop.f32.mrb[24].mxu1 }
 0x5ef   :  { %v1702_v60 = vpop.f32.mrb[25].mxu1 }
 0x5f0   :  { %1896 = vmatprep.mubr.f32.mxu1 %v1702_v60 }
 0x5f1   :  { %1897 = vmatmul.mubr.f32.vlgmr.msra.gmra.mrb[26].mxu1 %v1700_v59 }
 0x5f9   :  { %v1771_v3 = vpop.f32.mrb[30].mxu0 }
 0x5fa   :  { %v2411_v4 = vpop.f32.mrb[31].mxu0  ;;  %2441 = vmatmul.mubr.msk.f32.vlgmr.msra.gmra.mrb[32].mxu0 %vm1828_vm11, %v1771_v3 }
 0x6c4   :  { %v2216_v5 = vpop.f32.mrb[26].mxu1 }
 0x6c5   :  { %v2217_v6 = vpop.f32.mrb[27].mxu1 }
 0x6c6   :  { %v2218_v7 = vadd.f32 %v2217_v6, %v2216_v5 }
 0x6c8   :  { %v1899_v10 = vadd.f32 %v2218_v7, %v2077_v8 }
 0x6cd   :  { %v1968_v49 = vpop.f32.mrb[32].mxu0 }
 0x6ce   :  { %v1969_v1 = vadd.f32 %v1968_v49, %v1899_v10  ;;  %v2442_v61 = vpop.f32.mrb[33].mxu0 }
 0x6d0   :  { %1972 = vst [vmem:[#allocation2] sm:$0x3] %v1969_v1 }
 0x6d1   :  { %2628 = shalt.err (!%p2625_p4)
}
 0x6d2   :  { %s2629_s11 = scalar_lea.hbm %s3253_s14, 32 }
 0x6d3   :  { %p2630_p5 = scmp.ne.s32.totalorder %s3253_s14, %s2629_s11  ;;  %p2633_p6 = scmp.lt.u32.totalorder %s2629_s11, %s3253_s14 }
 0x6d5   :  { %p2635_p7 = pnand %p2633_p6, %p2630_p5 }
 0x6d7   :  { %2638 = shalt.err (!%p2635_p7)
}
 0x6d8   :  { %1982 = dma.vmem_to_hbm [thread:$0]  %s1980_s9, 32, %s3253_s14, [#allocation3]  }
 0x6d9   :  { %2639 = dma.done.wait [#allocation3], 32  }
 0x6da   :  { %2640 = vsyncadd [#allocation3], 4294967264 }
 0x6db   :  { %1986 = vsyncpa [#allocation3], 1 }

</bundles_post_ra>
